<compile_context>
chip_gen: v5e
topology: v5e:2x2
jax: 0.10.0
libtpu: 0.0.40
codegen_flags: <defaults>
</compile_context>

<pallas_src>
import functools

import jax
import jax.numpy as jnp
from jax.experimental import pallas as pl
from jax.experimental.pallas import tpu as pltpu


def _vmem_limit_bytes():
    """Per-chip scoped-VMEM limit: half of physical, clamped to [32, 64] MiB."""
    try:
        cap = pltpu.get_tpu_info().vmem_capacity_bytes
    except Exception:  # conservative default if the query is unavailable
        cap = 64 * 1024 * 1024
    return int(min(max(cap // 2, 32 * 1024 * 1024), 64 * 1024 * 1024))


# ---------------------------------------------------------------------------
# Fused per-batch kernel:
#   GEMM1: Conv2d(kernel=(past_t, S)) + BN2d + ReLU   (im2col-free, dt loop)
#   GEMM2: ConvTranspose2d(kernel=(1, S))             (bf16 operands by default)
#   GEMM3: Conv1d(kernel=1) + BN1d                    (fused, per-hidden dots)
# ---------------------------------------------------------------------------
def _sann_fused_kernel(x_ref, w1_ref, s1_ref, wt_ref, bt_ref, w2_ref, s3_ref,
                       o_ref, y2_ref, *, t_len, past_t, n_points, hidden_dim,
                       n_reg_out, compute_dtype):
    T, P, S, H, O = t_len, past_t, n_points, hidden_dim, n_reg_out

    # ---- GEMM1: accumulate the past_t causal time shifts (no im2col) -------
    # x_ref: (Tp, C*S) causally padded; w1_ref: (past_t, C*S, H) BN-scaled.
    y1 = jnp.dot(x_ref[pl.ds(0, T), :], w1_ref[0],
                 preferred_element_type=jnp.float32)
    for dt in range(1, P):                                  # tiny static loop
        y1 += jnp.dot(x_ref[pl.ds(dt, T), :], w1_ref[dt],
                      preferred_element_type=jnp.float32)
    y1 = jnp.maximum(y1 + s1_ref[...], 0.0)                 # BN shift + ReLU

    # ---- GEMM2: ConvTranspose2d(kernel=(1, S)) -> (T, H*S) -----------------
    # wt_ref: (H, H*S), columns ordered (out_channel, s). Dropout2d: identity.
    y2_ref[...] = (jnp.dot(y1.astype(compute_dtype), wt_ref[...],
                           preferred_element_type=jnp.float32)
                   + bt_ref[...])

    # ---- GEMM3: Conv1d(k=1) + BN1d, contracting over (hidden, t) -----------
    # w2_ref: (H, O, T); the per-h slices of y2 provide the (t, h) -> regressor
    # re-layout without any explicit transpose / HBM round-trip.
    acc = jnp.dot(w2_ref[0], y2_ref[:, 0:S],
                  preferred_element_type=jnp.float32)
    for h in range(1, H):                                   # static unrolled
        acc += jnp.dot(w2_ref[h], y2_ref[:, h * S:(h + 1) * S],
                       preferred_element_type=jnp.float32)
    o_ref[...] = (acc + s3_ref[...]).astype(o_ref.dtype)


# ---------------------------------------------------------------------------
# Parameter init (deterministic, synthetic; mirrors the PyTorch module)
# ---------------------------------------------------------------------------
def init_params(key, n_inp, n_out, t_inp, t_out, n_points, past_t, hidden_dim):
    ks = jax.random.split(key, 12)
    O = t_out * n_out
    return {
        # AgnosticConvBlock: Conv2d(n_inp -> hidden, kernel=(past_t, n_points)) + BN2d
        "W1": 0.1 * jax.random.normal(ks[0], (hidden_dim, n_inp, past_t, n_points), jnp.float32),
        "b1": 0.1 * jax.random.normal(ks[1], (hidden_dim,), jnp.float32),
        "bn1_gamma": 1.0 + 0.1 * jax.random.normal(ks[2], (hidden_dim,), jnp.float32),
        "bn1_beta": 0.1 * jax.random.normal(ks[3], (hidden_dim,), jnp.float32),
        "bn1_mean": 0.1 * jax.random.normal(ks[4], (hidden_dim,), jnp.float32),
        "bn1_var": 1.0 + jnp.abs(jax.random.normal(ks[5], (hidden_dim,), jnp.float32)),
        # ConvTranspose2d(hidden -> hidden, kernel=(1, n_points)); layout (in, out, kH, kW)
        "WT": 0.1 * jax.random.normal(ks[6], (hidden_dim, hidden_dim, 1, n_points), jnp.float32),
        "bT": 0.1 * jax.random.normal(ks[7], (hidden_dim,), jnp.float32),
        # ConvRegBlock: Conv1d(hidden*t_inp -> t_out*n_out, kernel=1) + BN1d
        "W2": 0.05 * jax.random.normal(ks[8], (O, hidden_dim * t_inp, 1), jnp.float32),
        "b2": 0.1 * jax.random.normal(ks[9], (O,), jnp.float32),
        "bn2_gamma": 1.0 + 0.1 * jax.random.normal(ks[10], (O,), jnp.float32),
        "bn2_beta": 0.1 * jax.random.normal(ks[11], (O,), jnp.float32),
        "bn2_mean": jnp.zeros((O,), jnp.float32),
        "bn2_var": jnp.ones((O,), jnp.float32),
    }


# ---------------------------------------------------------------------------
# SANN forward: all heavy compute in the fused Pallas kernel above
# ---------------------------------------------------------------------------
def sann_forward(x, adj, params, *, n_out, t_out, past_t, hidden_dim,
                 eps=1e-5, compute_dtype=jnp.bfloat16):
    del adj  # unused by the reference PyTorch forward as well
    N, C, S, T = x.shape
    H = hidden_dim
    O = t_out * n_out
    P = past_t
    Tp = T + P - 1
    CS = C * S
    HS = H * S
    f32 = jnp.float32

    # ---- input: (N, C, S, T) -> (N, Tp, C*S), causal zero-pad on time ------
    xr = jnp.transpose(x, (0, 3, 1, 2)).reshape(N, T, CS)
    xr = jnp.pad(xr, ((0, 0), (P - 1, 0), (0, 0))).astype(f32)

    # ---- fold eval-mode BN scales into the weights (tiny, wrapper-side) ----
    s1 = params["bn1_gamma"] / jnp.sqrt(params["bn1_var"] + eps)
    w1r = (jnp.transpose(params["W1"], (2, 1, 3, 0)).reshape(P, CS, H)
           * s1[None, None, :]).astype(f32)                                # (P, CS, H)
    shift1 = (params["b1"] * s1 + params["bn1_beta"]
              - params["bn1_mean"] * s1).reshape(1, H).astype(f32)

    wts = params["WT"].reshape(H, HS).astype(compute_dtype)                # (H_in, (o, s))
    bt = jnp.repeat(params["bT"], S).reshape(1, HS).astype(f32)

    s3 = params["bn2_gamma"] / jnp.sqrt(params["bn2_var"] + eps)
    w2s = params["W2"][:, :, 0] * s3[:, None]                              # (O, H*T)
    w2r = jnp.transpose(w2s.reshape(O, H, T), (1, 0, 2)).astype(f32)       # (H, O, T)
    shift3 = (params["b2"] * s3 + params["bn2_beta"]
              - params["bn2_mean"] * s3).reshape(O, 1).astype(f32)

    kernel = functools.partial(
        _sann_fused_kernel, t_len=T, past_t=P, n_points=S, hidden_dim=H,
        n_reg_out=O, compute_dtype=compute_dtype)

    out = pl.pallas_call(
        kernel,
        out_shape=jax.ShapeDtypeStruct((N, O, S), jnp.float32),
        grid=(N,),
        in_specs=[
            pl.BlockSpec((None, Tp, CS), lambda n: (n, 0, 0)),   # x, per batch
            pl.BlockSpec((P, CS, H), lambda n: (0, 0, 0)),       # Conv2d weights (invariant)
            pl.BlockSpec((1, H), lambda n: (0, 0)),              # BN2d shift
            pl.BlockSpec((H, HS), lambda n: (0, 0)),             # ConvT weights (invariant)
            pl.BlockSpec((1, HS), lambda n: (0, 0)),             # ConvT bias
            pl.BlockSpec((H, O, T), lambda n: (0, 0, 0)),        # Conv1d weights (invariant)
            pl.BlockSpec((O, 1), lambda n: (0, 0)),              # BN1d shift
        ],
        out_specs=pl.BlockSpec((None, O, S), lambda n: (n, 0, 0)),
        scratch_shapes=[pltpu.VMEM((T, HS), jnp.float32)],       # y2 intermediate (VMEM only)
        compiler_params=pltpu.CompilerParams(
            dimension_semantics=("parallel",),
            vmem_limit_bytes=_vmem_limit_bytes()),
    )(xr, w1r, shift1, wts, bt, w2r, shift3)

    return out.reshape(N, n_out, S, t_out)


# ---------------------------------------------------------------------------
# Pure-JAX reference (no Pallas) for sanity checking
# ---------------------------------------------------------------------------
def sann_reference(x, adj, params, *, n_out, t_out, past_t, hidden_dim, eps=1e-5):
    del adj
    hi = jax.lax.Precision.HIGHEST
    N, C, S, T = x.shape
    xt = jnp.transpose(x, (0, 1, 3, 2))
    xp = jnp.pad(xt, ((0, 0), (0, 0), (past_t - 1, 0), (0, 0)))
    conv = jax.lax.conv_general_dilated(
        xp, params["W1"], window_strides=(1, 1), padding="VALID",
        dimension_numbers=("NCHW", "OIHW", "NCHW"),
        precision=hi) + params["b1"][None, :, None, None]
    s1 = params["bn1_gamma"] / jnp.sqrt(params["bn1_var"] + eps)
    h1 = (conv - params["bn1_mean"][None, :, None, None]) * s1[None, :, None, None] \
        + params["bn1_beta"][None, :, None, None]
    h1 = jnp.maximum(h1, 0.0)                                                      # (N, H, T, 1)
    hin = h1[:, :, :, 0]
    WT = params["WT"][:, :, 0, :]
    h2 = jnp.einsum("nit,ios->nots", hin, WT, precision=hi) \
        + params["bT"][None, :, None, None]                                        # (N, H, T, S)
    X = h2.reshape(N, hidden_dim * T, S)
    W2 = params["W2"][:, :, 0]
    r = jnp.einsum("nks,ok->nos", X, W2, precision=hi) + params["b2"][None, :, None]
    s3 = params["bn2_gamma"] / jnp.sqrt(params["bn2_var"] + eps)
    r = (r - params["bn2_mean"][None, :, None]) * s3[None, :, None] \
        + params["bn2_beta"][None, :, None]
    return r.reshape(N, n_out, S, t_out)


if __name__ == "__main__":
    # Small config consistent with the module's forward
    n_inp, n_out = 4, 2
    t_inp, t_out = 8, 4
    n_points, past_t = 16, 3
    hidden_dim = 32
    N = 2

    key = jax.random.PRNGKey(0)
    kx, ka, kp = jax.random.split(key, 3)
    x = jax.random.normal(kx, (N, n_inp, n_points, t_inp), jnp.float32)   # (N, C, S, T)
    adj = jax.random.normal(ka, (n_points, n_points), jnp.float32)        # unused, matches signature
    params = init_params(kp, n_inp, n_out, t_inp, t_out, n_points, past_t, hidden_dim)

    ref = sann_reference(x, adj, params, n_out=n_out, t_out=t_out,
                         past_t=past_t, hidden_dim=hidden_dim)

    # float32 compute path: tight check against the pure-JAX reference.
    out_f32 = jax.block_until_ready(
        sann_forward(x, adj, params, n_out=n_out, t_out=t_out, past_t=past_t,
                     hidden_dim=hidden_dim, compute_dtype=jnp.float32))
    assert out_f32.shape == (N, n_out, n_points, t_out), out_f32.shape
    assert jnp.allclose(out_f32, ref, atol=2e-4, rtol=2e-4), \
        float(jnp.max(jnp.abs(out_f32 - ref)))

    # bfloat16 compute path (default; MXU-native on v6e/v7x): loose sanity check.
    out_bf16 = jax.block_until_ready(
        sann_forward(x, adj, params, n_out=n_out, t_out=t_out, past_t=past_t,
                     hidden_dim=hidden_dim, compute_dtype=jnp.bfloat16))
    assert out_bf16.shape == (N, n_out, n_points, t_out), out_bf16.shape
    assert bool(jnp.isfinite(out_bf16).all())
    assert jnp.allclose(out_bf16, ref, atol=2e-1, rtol=2e-1), \
        float(jnp.max(jnp.abs(out_bf16 - ref)))

    print("KERNEL_OK")
</pallas_src>

<mosaic_0001>
module attributes {stable_mosaic.version = 11 : i64} {
  func.func @_sann_fused_kernel(%arg0: i32, %arg1: memref<1x10x64xf32, #tpu.memory_space<vmem>>, %arg2: memref<3x64x32xf32, #tpu.memory_space<vmem>>, %arg3: memref<1x32xf32, #tpu.memory_space<vmem>>, %arg4: memref<32x512xf32, #tpu.memory_space<vmem>>, %arg5: memref<1x512xf32, #tpu.memory_space<vmem>>, %arg6: memref<32x8x8xf32, #tpu.memory_space<vmem>>, %arg7: memref<8x1xf32, #tpu.memory_space<vmem>>, %arg8: memref<1x8x16xf32, #tpu.memory_space<vmem>>, %arg9: memref<8x512xf32, #tpu.memory_space<vmem>>) attributes {dimension_semantics = [#tpu.dimension_semantics<parallel>], iteration_bounds = array<i64: 2>, scalar_prefetch = 0 : i64, scratch_operands = 1 : i64, tpu.core_type = #tpu.core_type<tc>, window_params = [{transform_indices = @transform_0, window_bounds = array<i64: 1, 10, 64>}, {pipeline_mode = #tpu.pipeline_mode<synchronous>, transform_indices = @transform_1, window_bounds = array<i64: 3, 64, 32>}, {pipeline_mode = #tpu.pipeline_mode<synchronous>, transform_indices = @transform_2, window_bounds = array<i64: 1, 32>}, {pipeline_mode = #tpu.pipeline_mode<synchronous>, transform_indices = @transform_3, window_bounds = array<i64: 32, 512>}, {pipeline_mode = #tpu.pipeline_mode<synchronous>, transform_indices = @transform_4, window_bounds = array<i64: 1, 512>}, {pipeline_mode = #tpu.pipeline_mode<synchronous>, transform_indices = @transform_5, window_bounds = array<i64: 32, 8, 8>}, {pipeline_mode = #tpu.pipeline_mode<synchronous>, transform_indices = @transform_6, window_bounds = array<i64: 8, 1>}, {transform_indices = @transform_7, window_bounds = array<i64: 1, 8, 16>}]} {
    %c0 = arith.constant 0 : index
    %c0_0 = arith.constant 0 : index
    %c0_1 = arith.constant 0 : index
    %0 = vector.load %arg1[%c0, %c0_0, %c0_1] : memref<1x10x64xf32, #tpu.memory_space<vmem>>, vector<1x8x64xf32>
    %1 = vector.shape_cast %0 : vector<1x8x64xf32> to vector<8x64xf32>
    %c0_2 = arith.constant 0 : index
    %c0_3 = arith.constant 0 : index
    %c0_4 = arith.constant 0 : index
    %2 = vector.load %arg2[%c0_2, %c0_3, %c0_4] : memref<3x64x32xf32, #tpu.memory_space<vmem>>, vector<1x64x32xf32>
    %3 = vector.shape_cast %2 : vector<1x64x32xf32> to vector<64x32xf32>
    %cst = arith.constant dense<0.000000e+00> : vector<8x32xf32>
    %4 = tpu.matmul %1, %3, %cst {dimension_numbers = #tpu.dot_dimension_numbers<[1], [0], [0], [1], [0, 0, 1, 1], [], []>} : vector<8x64xf32>, vector<64x32xf32>, vector<8x32xf32> -> vector<8x32xf32>
    %c0_5 = arith.constant 0 : index
    %c1 = arith.constant 1 : index
    %c0_6 = arith.constant 0 : index
    %5 = vector.load %arg1[%c0_5, %c1, %c0_6] : memref<1x10x64xf32, #tpu.memory_space<vmem>>, vector<1x8x64xf32>
    %6 = vector.shape_cast %5 : vector<1x8x64xf32> to vector<8x64xf32>
    %c1_7 = arith.constant 1 : index
    %c0_8 = arith.constant 0 : index
    %c0_9 = arith.constant 0 : index
    %7 = vector.load %arg2[%c1_7, %c0_8, %c0_9] : memref<3x64x32xf32, #tpu.memory_space<vmem>>, vector<1x64x32xf32>
    %8 = vector.shape_cast %7 : vector<1x64x32xf32> to vector<64x32xf32>
    %cst_10 = arith.constant dense<0.000000e+00> : vector<8x32xf32>
    %9 = tpu.matmul %6, %8, %cst_10 {dimension_numbers = #tpu.dot_dimension_numbers<[1], [0], [0], [1], [0, 0, 1, 1], [], []>} : vector<8x64xf32>, vector<64x32xf32>, vector<8x32xf32> -> vector<8x32xf32>
    %10 = arith.addf %4, %9 : vector<8x32xf32>
    %c0_11 = arith.constant 0 : index
    %c2 = arith.constant 2 : index
    %c0_12 = arith.constant 0 : index
    %11 = vector.load %arg1[%c0_11, %c2, %c0_12] : memref<1x10x64xf32, #tpu.memory_space<vmem>>, vector<1x8x64xf32>
    %12 = vector.shape_cast %11 : vector<1x8x64xf32> to vector<8x64xf32>
    %c2_13 = arith.constant 2 : index
    %c0_14 = arith.constant 0 : index
    %c0_15 = arith.constant 0 : index
    %13 = vector.load %arg2[%c2_13, %c0_14, %c0_15] : memref<3x64x32xf32, #tpu.memory_space<vmem>>, vector<1x64x32xf32>
    %14 = vector.shape_cast %13 : vector<1x64x32xf32> to vector<64x32xf32>
    %cst_16 = arith.constant dense<0.000000e+00> : vector<8x32xf32>
    %15 = tpu.matmul %12, %14, %cst_16 {dimension_numbers = #tpu.dot_dimension_numbers<[1], [0], [0], [1], [0, 0, 1, 1], [], []>} : vector<8x64xf32>, vector<64x32xf32>, vector<8x32xf32> -> vector<8x32xf32>
    %16 = arith.addf %10, %15 : vector<8x32xf32>
    %c0_17 = arith.constant 0 : index
    %c0_18 = arith.constant 0 : index
    %17 = vector.load %arg3[%c0_17, %c0_18] : memref<1x32xf32, #tpu.memory_space<vmem>>, vector<1x32xf32>
    %18 = vector.broadcast %17 : vector<1x32xf32> to vector<8x32xf32>
    %19 = arith.addf %16, %18 : vector<8x32xf32>
    %cst_19 = arith.constant 0.000000e+00 : f32
    %20 = vector.broadcast %cst_19 : f32 to vector<8x32xf32>
    %21 = arith.maximumf %19, %20 : vector<8x32xf32>
    %c0_20 = arith.constant 0 : index
    %c0_21 = arith.constant 0 : index
    %22 = vector.load %arg4[%c0_20, %c0_21] : memref<32x512xf32, #tpu.memory_space<vmem>>, vector<32x512xf32>
    %cst_22 = arith.constant dense<0.000000e+00> : vector<8x512xf32>
    %23 = tpu.matmul %21, %22, %cst_22 {dimension_numbers = #tpu.dot_dimension_numbers<[1], [0], [0], [1], [0, 0, 1, 1], [], []>} : vector<8x32xf32>, vector<32x512xf32>, vector<8x512xf32> -> vector<8x512xf32>
    %c0_23 = arith.constant 0 : index
    %c0_24 = arith.constant 0 : index
    %24 = vector.load %arg5[%c0_23, %c0_24] : memref<1x512xf32, #tpu.memory_space<vmem>>, vector<1x512xf32>
    %25 = vector.broadcast %24 : vector<1x512xf32> to vector<8x512xf32>
    %26 = arith.addf %23, %25 : vector<8x512xf32>
    %c0_25 = arith.constant 0 : index
    %c0_26 = arith.constant 0 : index
    %27 = vector.load %arg9[%c0_25, %c0_26] : memref<8x512xf32, #tpu.memory_space<vmem>>, vector<8x512xf32>
    tpu.vector_store %arg9[%c0_25, %c0_26], %26 {strides = array<i32>} : memref<8x512xf32, #tpu.memory_space<vmem>>, vector<8x512xf32>,
    %c0_27 = arith.constant 0 : index
    %c0_28 = arith.constant 0 : index
    %c0_29 = arith.constant 0 : index
    %28 = vector.load %arg6[%c0_27, %c0_28, %c0_29] : memref<32x8x8xf32, #tpu.memory_space<vmem>>, vector<1x8x8xf32>
    %29 = vector.shape_cast %28 : vector<1x8x8xf32> to vector<8x8xf32>
    %c0_30 = arith.constant 0 : index
    %c0_31 = arith.constant 0 : index
    %30 = vector.load %arg9[%c0_30, %c0_31] : memref<8x512xf32, #tpu.memory_space<vmem>>, vector<8x16xf32>
    %cst_32 = arith.constant dense<0.000000e+00> : vector<8x16xf32>
    %31 = tpu.matmul %29, %30, %cst_32 {dimension_numbers = #tpu.dot_dimension_numbers<[1], [0], [0], [1], [0, 0, 1, 1], [], []>} : vector<8x8xf32>, vector<8x16xf32>, vector<8x16xf32> -> vector<8x16xf32>
    %c1_33 = arith.constant 1 : index
    %c0_34 = arith.constant 0 : index
    %c0_35 = arith.constant 0 : index
    %32 = vector.load %arg6[%c1_33, %c0_34, %c0_35] : memref<32x8x8xf32, #tpu.memory_space<vmem>>, vector<1x8x8xf32>
    %33 = vector.shape_cast %32 : vector<1x8x8xf32> to vector<8x8xf32>
    %c0_36 = arith.constant 0 : index
    %c16 = arith.constant 16 : index
    %34 = vector.load %arg9[%c0_36, %c16] : memref<8x512xf32, #tpu.memory_space<vmem>>, vector<8x16xf32>
    %cst_37 = arith.constant dense<0.000000e+00> : vector<8x16xf32>
    %35 = tpu.matmul %33, %34, %cst_37 {dimension_numbers = #tpu.dot_dimension_numbers<[1], [0], [0], [1], [0, 0, 1, 1], [], []>} : vector<8x8xf32>, vector<8x16xf32>, vector<8x16xf32> -> vector<8x16xf32>
    %36 = arith.addf %31, %35 : vector<8x16xf32>
    %c2_38 = arith.constant 2 : index
    %c0_39 = arith.constant 0 : index
    %c0_40 = arith.constant 0 : index
    %37 = vector.load %arg6[%c2_38, %c0_39, %c0_40] : memref<32x8x8xf32, #tpu.memory_space<vmem>>, vector<1x8x8xf32>
    %38 = vector.shape_cast %37 : vector<1x8x8xf32> to vector<8x8xf32>
    %c0_41 = arith.constant 0 : index
    %c32 = arith.constant 32 : index
    %39 = vector.load %arg9[%c0_41, %c32] : memref<8x512xf32, #tpu.memory_space<vmem>>, vector<8x16xf32>
    %cst_42 = arith.constant dense<0.000000e+00> : vector<8x16xf32>
    %40 = tpu.matmul %38, %39, %cst_42 {dimension_numbers = #tpu.dot_dimension_numbers<[1], [0], [0], [1], [0, 0, 1, 1], [], []>} : vector<8x8xf32>, vector<8x16xf32>, vector<8x16xf32> -> vector<8x16xf32>
    %41 = arith.addf %36, %40 : vector<8x16xf32>
    %c3 = arith.constant 3 : index
    %c0_43 = arith.constant 0 : index
    %c0_44 = arith.constant 0 : index
    %42 = vector.load %arg6[%c3, %c0_43, %c0_44] : memref<32x8x8xf32, #tpu.memory_space<vmem>>, vector<1x8x8xf32>
    %43 = vector.shape_cast %42 : vector<1x8x8xf32> to vector<8x8xf32>
    %c0_45 = arith.constant 0 : index
    %c48 = arith.constant 48 : index
    %44 = vector.load %arg9[%c0_45, %c48] : memref<8x512xf32, #tpu.memory_space<vmem>>, vector<8x16xf32>
    %cst_46 = arith.constant dense<0.000000e+00> : vector<8x16xf32>
    %45 = tpu.matmul %43, %44, %cst_46 {dimension_numbers = #tpu.dot_dimension_numbers<[1], [0], [0], [1], [0, 0, 1, 1], [], []>} : vector<8x8xf32>, vector<8x16xf32>, vector<8x16xf32> -> vector<8x16xf32>
    %46 = arith.addf %41, %45 : vector<8x16xf32>
    %c4 = arith.constant 4 : index
    %c0_47 = arith.constant 0 : index
    %c0_48 = arith.constant 0 : index
    %47 = vector.load %arg6[%c4, %c0_47, %c0_48] : memref<32x8x8xf32, #tpu.memory_space<vmem>>, vector<1x8x8xf32>
    %48 = vector.shape_cast %47 : vector<1x8x8xf32> to vector<8x8xf32>
    %c0_49 = arith.constant 0 : index
    %c64 = arith.constant 64 : index
    %49 = vector.load %arg9[%c0_49, %c64] : memref<8x512xf32, #tpu.memory_space<vmem>>, vector<8x16xf32>
    %cst_50 = arith.constant dense<0.000000e+00> : vector<8x16xf32>
    %50 = tpu.matmul %48, %49, %cst_50 {dimension_numbers = #tpu.dot_dimension_numbers<[1], [0], [0], [1], [0, 0, 1, 1], [], []>} : vector<8x8xf32>, vector<8x16xf32>, vector<8x16xf32> -> vector<8x16xf32>
    %51 = arith.addf %46, %50 : vector<8x16xf32>
    %c5 = arith.constant 5 : index
    %c0_51 = arith.constant 0 : index
    %c0_52 = arith.constant 0 : index
    %52 = vector.load %arg6[%c5, %c0_51, %c0_52] : memref<32x8x8xf32, #tpu.memory_space<vmem>>, vector<1x8x8xf32>
    %53 = vector.shape_cast %52 : vector<1x8x8xf32> to vector<8x8xf32>
    %c0_53 = arith.constant 0 : index
    %c80 = arith.constant 80 : index
    %54 = vector.load %arg9[%c0_53, %c80] : memref<8x512xf32, #tpu.memory_space<vmem>>, vector<8x16xf32>
    %cst_54 = arith.constant dense<0.000000e+00> : vector<8x16xf32>
    %55 = tpu.matmul %53, %54, %cst_54 {dimension_numbers = #tpu.dot_dimension_numbers<[1], [0], [0], [1], [0, 0, 1, 1], [], []>} : vector<8x8xf32>, vector<8x16xf32>, vector<8x16xf32> -> vector<8x16xf32>
    %56 = arith.addf %51, %55 : vector<8x16xf32>
    %c6 = arith.constant 6 : index
    %c0_55 = arith.constant 0 : index
    %c0_56 = arith.constant 0 : index
    %57 = vector.load %arg6[%c6, %c0_55, %c0_56] : memref<32x8x8xf32, #tpu.memory_space<vmem>>, vector<1x8x8xf32>
    %58 = vector.shape_cast %57 : vector<1x8x8xf32> to vector<8x8xf32>
    %c0_57 = arith.constant 0 : index
    %c96 = arith.constant 96 : index
    %59 = vector.load %arg9[%c0_57, %c96] : memref<8x512xf32, #tpu.memory_space<vmem>>, vector<8x16xf32>
    %cst_58 = arith.constant dense<0.000000e+00> : vector<8x16xf32>
    %60 = tpu.matmul %58, %59, %cst_58 {dimension_numbers = #tpu.dot_dimension_numbers<[1], [0], [0], [1], [0, 0, 1, 1], [], []>} : vector<8x8xf32>, vector<8x16xf32>, vector<8x16xf32> -> vector<8x16xf32>
    %61 = arith.addf %56, %60 : vector<8x16xf32>
    %c7 = arith.constant 7 : index
    %c0_59 = arith.constant 0 : index
    %c0_60 = arith.constant 0 : index
    %62 = vector.load %arg6[%c7, %c0_59, %c0_60] : memref<32x8x8xf32, #tpu.memory_space<vmem>>, vector<1x8x8xf32>
    %63 = vector.shape_cast %62 : vector<1x8x8xf32> to vector<8x8xf32>
    %c0_61 = arith.constant 0 : index
    %c112 = arith.constant 112 : index
    %64 = vector.load %arg9[%c0_61, %c112] : memref<8x512xf32, #tpu.memory_space<vmem>>, vector<8x16xf32>
    %cst_62 = arith.constant dense<0.000000e+00> : vector<8x16xf32>
    %65 = tpu.matmul %63, %64, %cst_62 {dimension_numbers = #tpu.dot_dimension_numbers<[1], [0], [0], [1], [0, 0, 1, 1], [], []>} : vector<8x8xf32>, vector<8x16xf32>, vector<8x16xf32> -> vector<8x16xf32>
    %66 = arith.addf %61, %65 : vector<8x16xf32>
    %c8 = arith.constant 8 : index
    %c0_63 = arith.constant 0 : index
    %c0_64 = arith.constant 0 : index
    %67 = vector.load %arg6[%c8, %c0_63, %c0_64] : memref<32x8x8xf32, #tpu.memory_space<vmem>>, vector<1x8x8xf32>
    %68 = vector.shape_cast %67 : vector<1x8x8xf32> to vector<8x8xf32>
    %c0_65 = arith.constant 0 : index
    %c128 = arith.constant 128 : index
    %69 = vector.load %arg9[%c0_65, %c128] : memref<8x512xf32, #tpu.memory_space<vmem>>, vector<8x16xf32>
    %cst_66 = arith.constant dense<0.000000e+00> : vector<8x16xf32>
    %70 = tpu.matmul %68, %69, %cst_66 {dimension_numbers = #tpu.dot_dimension_numbers<[1], [0], [0], [1], [0, 0, 1, 1], [], []>} : vector<8x8xf32>, vector<8x16xf32>, vector<8x16xf32> -> vector<8x16xf32>
    %71 = arith.addf %66, %70 : vector<8x16xf32>
    %c9 = arith.constant 9 : index
    %c0_67 = arith.constant 0 : index
    %c0_68 = arith.constant 0 : index
    %72 = vector.load %arg6[%c9, %c0_67, %c0_68] : memref<32x8x8xf32, #tpu.memory_space<vmem>>, vector<1x8x8xf32>
    %73 = vector.shape_cast %72 : vector<1x8x8xf32> to vector<8x8xf32>
    %c0_69 = arith.constant 0 : index
    %c144 = arith.constant 144 : index
    %74 = vector.load %arg9[%c0_69, %c144] : memref<8x512xf32, #tpu.memory_space<vmem>>, vector<8x16xf32>
    %cst_70 = arith.constant dense<0.000000e+00> : vector<8x16xf32>
    %75 = tpu.matmul %73, %74, %cst_70 {dimension_numbers = #tpu.dot_dimension_numbers<[1], [0], [0], [1], [0, 0, 1, 1], [], []>} : vector<8x8xf32>, vector<8x16xf32>, vector<8x16xf32> -> vector<8x16xf32>
    %76 = arith.addf %71, %75 : vector<8x16xf32>
    %c10 = arith.constant 10 : index
    %c0_71 = arith.constant 0 : index
    %c0_72 = arith.constant 0 : index
    %77 = vector.load %arg6[%c10, %c0_71, %c0_72] : memref<32x8x8xf32, #tpu.memory_space<vmem>>, vector<1x8x8xf32>
    %78 = vector.shape_cast %77 : vector<1x8x8xf32> to vector<8x8xf32>
    %c0_73 = arith.constant 0 : index
    %c160 = arith.constant 160 : index
    %79 = vector.load %arg9[%c0_73, %c160] : memref<8x512xf32, #tpu.memory_space<vmem>>, vector<8x16xf32>
    %cst_74 = arith.constant dense<0.000000e+00> : vector<8x16xf32>
    %80 = tpu.matmul %78, %79, %cst_74 {dimension_numbers = #tpu.dot_dimension_numbers<[1], [0], [0], [1], [0, 0, 1, 1], [], []>} : vector<8x8xf32>, vector<8x16xf32>, vector<8x16xf32> -> vector<8x16xf32>
    %81 = arith.addf %76, %80 : vector<8x16xf32>
    %c11 = arith.constant 11 : index
    %c0_75 = arith.constant 0 : index
    %c0_76 = arith.constant 0 : index
    %82 = vector.load %arg6[%c11, %c0_75, %c0_76] : memref<32x8x8xf32, #tpu.memory_space<vmem>>, vector<1x8x8xf32>
    %83 = vector.shape_cast %82 : vector<1x8x8xf32> to vector<8x8xf32>
    %c0_77 = arith.constant 0 : index
    %c176 = arith.constant 176 : index
    %84 = vector.load %arg9[%c0_77, %c176] : memref<8x512xf32, #tpu.memory_space<vmem>>, vector<8x16xf32>
    %cst_78 = arith.constant dense<0.000000e+00> : vector<8x16xf32>
    %85 = tpu.matmul %83, %84, %cst_78 {dimension_numbers = #tpu.dot_dimension_numbers<[1], [0], [0], [1], [0, 0, 1, 1], [], []>} : vector<8x8xf32>, vector<8x16xf32>, vector<8x16xf32> -> vector<8x16xf32>
    %86 = arith.addf %81, %85 : vector<8x16xf32>
    %c12 = arith.constant 12 : index
    %c0_79 = arith.constant 0 : index
    %c0_80 = arith.constant 0 : index
    %87 = vector.load %arg6[%c12, %c0_79, %c0_80] : memref<32x8x8xf32, #tpu.memory_space<vmem>>, vector<1x8x8xf32>
    %88 = vector.shape_cast %87 : vector<1x8x8xf32> to vector<8x8xf32>
    %c0_81 = arith.constant 0 : index
    %c192 = arith.constant 192 : index
    %89 = vector.load %arg9[%c0_81, %c192] : memref<8x512xf32, #tpu.memory_space<vmem>>, vector<8x16xf32>
    %cst_82 = arith.constant dense<0.000000e+00> : vector<8x16xf32>
    %90 = tpu.matmul %88, %89, %cst_82 {dimension_numbers = #tpu.dot_dimension_numbers<[1], [0], [0], [1], [0, 0, 1, 1], [], []>} : vector<8x8xf32>, vector<8x16xf32>, vector<8x16xf32> -> vector<8x16xf32>
    %91 = arith.addf %86, %90 : vector<8x16xf32>
    %c13 = arith.constant 13 : index
    %c0_83 = arith.constant 0 : index
    %c0_84 = arith.constant 0 : index
    %92 = vector.load %arg6[%c13, %c0_83, %c0_84] : memref<32x8x8xf32, #tpu.memory_space<vmem>>, vector<1x8x8xf32>
    %93 = vector.shape_cast %92 : vector<1x8x8xf32> to vector<8x8xf32>
    %c0_85 = arith.constant 0 : index
    %c208 = arith.constant 208 : index
    %94 = vector.load %arg9[%c0_85, %c208] : memref<8x512xf32, #tpu.memory_space<vmem>>, vector<8x16xf32>
    %cst_86 = arith.constant dense<0.000000e+00> : vector<8x16xf32>
    %95 = tpu.matmul %93, %94, %cst_86 {dimension_numbers = #tpu.dot_dimension_numbers<[1], [0], [0], [1], [0, 0, 1, 1], [], []>} : vector<8x8xf32>, vector<8x16xf32>, vector<8x16xf32> -> vector<8x16xf32>
    %96 = arith.addf %91, %95 : vector<8x16xf32>
    %c14 = arith.constant 14 : index
    %c0_87 = arith.constant 0 : index
    %c0_88 = arith.constant 0 : index
    %97 = vector.load %arg6[%c14, %c0_87, %c0_88] : memref<32x8x8xf32, #tpu.memory_space<vmem>>, vector<1x8x8xf32>
    %98 = vector.shape_cast %97 : vector<1x8x8xf32> to vector<8x8xf32>
    %c0_89 = arith.constant 0 : index
    %c224 = arith.constant 224 : index
    %99 = vector.load %arg9[%c0_89, %c224] : memref<8x512xf32, #tpu.memory_space<vmem>>, vector<8x16xf32>
    %cst_90 = arith.constant dense<0.000000e+00> : vector<8x16xf32>
    %100 = tpu.matmul %98, %99, %cst_90 {dimension_numbers = #tpu.dot_dimension_numbers<[1], [0], [0], [1], [0, 0, 1, 1], [], []>} : vector<8x8xf32>, vector<8x16xf32>, vector<8x16xf32> -> vector<8x16xf32>
    %101 = arith.addf %96, %100 : vector<8x16xf32>
    %c15 = arith.constant 15 : index
    %c0_91 = arith.constant 0 : index
    %c0_92 = arith.constant 0 : index
    %102 = vector.load %arg6[%c15, %c0_91, %c0_92] : memref<32x8x8xf32, #tpu.memory_space<vmem>>, vector<1x8x8xf32>
    %103 = vector.shape_cast %102 : vector<1x8x8xf32> to vector<8x8xf32>
    %c0_93 = arith.constant 0 : index
    %c240 = arith.constant 240 : index
    %104 = vector.load %arg9[%c0_93, %c240] : memref<8x512xf32, #tpu.memory_space<vmem>>, vector<8x16xf32>
    %cst_94 = arith.constant dense<0.000000e+00> : vector<8x16xf32>
    %105 = tpu.matmul %103, %104, %cst_94 {dimension_numbers = #tpu.dot_dimension_numbers<[1], [0], [0], [1], [0, 0, 1, 1], [], []>} : vector<8x8xf32>, vector<8x16xf32>, vector<8x16xf32> -> vector<8x16xf32>
    %106 = arith.addf %101, %105 : vector<8x16xf32>
    %c16_95 = arith.constant 16 : index
    %c0_96 = arith.constant 0 : index
    %c0_97 = arith.constant 0 : index
    %107 = vector.load %arg6[%c16_95, %c0_96, %c0_97] : memref<32x8x8xf32, #tpu.memory_space<vmem>>, vector<1x8x8xf32>
    %108 = vector.shape_cast %107 : vector<1x8x8xf32> to vector<8x8xf32>
    %c0_98 = arith.constant 0 : index
    %c256 = arith.constant 256 : index
    %109 = vector.load %arg9[%c0_98, %c256] : memref<8x512xf32, #tpu.memory_space<vmem>>, vector<8x16xf32>
    %cst_99 = arith.constant dense<0.000000e+00> : vector<8x16xf32>
    %110 = tpu.matmul %108, %109, %cst_99 {dimension_numbers = #tpu.dot_dimension_numbers<[1], [0], [0], [1], [0, 0, 1, 1], [], []>} : vector<8x8xf32>, vector<8x16xf32>, vector<8x16xf32> -> vector<8x16xf32>
    %111 = arith.addf %106, %110 : vector<8x16xf32>
    %c17 = arith.constant 17 : index
    %c0_100 = arith.constant 0 : index
    %c0_101 = arith.constant 0 : index
    %112 = vector.load %arg6[%c17, %c0_100, %c0_101] : memref<32x8x8xf32, #tpu.memory_space<vmem>>, vector<1x8x8xf32>
    %113 = vector.shape_cast %112 : vector<1x8x8xf32> to vector<8x8xf32>
    %c0_102 = arith.constant 0 : index
    %c272 = arith.constant 272 : index
    %114 = vector.load %arg9[%c0_102, %c272] : memref<8x512xf32, #tpu.memory_space<vmem>>, vector<8x16xf32>
    %cst_103 = arith.constant dense<0.000000e+00> : vector<8x16xf32>
    %115 = tpu.matmul %113, %114, %cst_103 {dimension_numbers = #tpu.dot_dimension_numbers<[1], [0], [0], [1], [0, 0, 1, 1], [], []>} : vector<8x8xf32>, vector<8x16xf32>, vector<8x16xf32> -> vector<8x16xf32>
    %116 = arith.addf %111, %115 : vector<8x16xf32>
    %c18 = arith.constant 18 : index
    %c0_104 = arith.constant 0 : index
    %c0_105 = arith.constant 0 : index
    %117 = vector.load %arg6[%c18, %c0_104, %c0_105] : memref<32x8x8xf32, #tpu.memory_space<vmem>>, vector<1x8x8xf32>
    %118 = vector.shape_cast %117 : vector<1x8x8xf32> to vector<8x8xf32>
    %c0_106 = arith.constant 0 : index
    %c288 = arith.constant 288 : index
    %119 = vector.load %arg9[%c0_106, %c288] : memref<8x512xf32, #tpu.memory_space<vmem>>, vector<8x16xf32>
    %cst_107 = arith.constant dense<0.000000e+00> : vector<8x16xf32>
    %120 = tpu.matmul %118, %119, %cst_107 {dimension_numbers = #tpu.dot_dimension_numbers<[1], [0], [0], [1], [0, 0, 1, 1], [], []>} : vector<8x8xf32>, vector<8x16xf32>, vector<8x16xf32> -> vector<8x16xf32>
    %121 = arith.addf %116, %120 : vector<8x16xf32>
    %c19 = arith.constant 19 : index
    %c0_108 = arith.constant 0 : index
    %c0_109 = arith.constant 0 : index
    %122 = vector.load %arg6[%c19, %c0_108, %c0_109] : memref<32x8x8xf32, #tpu.memory_space<vmem>>, vector<1x8x8xf32>
    %123 = vector.shape_cast %122 : vector<1x8x8xf32> to vector<8x8xf32>
    %c0_110 = arith.constant 0 : index
    %c304 = arith.constant 304 : index
    %124 = vector.load %arg9[%c0_110, %c304] : memref<8x512xf32, #tpu.memory_space<vmem>>, vector<8x16xf32>
    %cst_111 = arith.constant dense<0.000000e+00> : vector<8x16xf32>
    %125 = tpu.matmul %123, %124, %cst_111 {dimension_numbers = #tpu.dot_dimension_numbers<[1], [0], [0], [1], [0, 0, 1, 1], [], []>} : vector<8x8xf32>, vector<8x16xf32>, vector<8x16xf32> -> vector<8x16xf32>
    %126 = arith.addf %121, %125 : vector<8x16xf32>
    %c20 = arith.constant 20 : index
    %c0_112 = arith.constant 0 : index
    %c0_113 = arith.constant 0 : index
    %127 = vector.load %arg6[%c20, %c0_112, %c0_113] : memref<32x8x8xf32, #tpu.memory_space<vmem>>, vector<1x8x8xf32>
    %128 = vector.shape_cast %127 : vector<1x8x8xf32> to vector<8x8xf32>
    %c0_114 = arith.constant 0 : index
    %c320 = arith.constant 320 : index
    %129 = vector.load %arg9[%c0_114, %c320] : memref<8x512xf32, #tpu.memory_space<vmem>>, vector<8x16xf32>
    %cst_115 = arith.constant dense<0.000000e+00> : vector<8x16xf32>
    %130 = tpu.matmul %128, %129, %cst_115 {dimension_numbers = #tpu.dot_dimension_numbers<[1], [0], [0], [1], [0, 0, 1, 1], [], []>} : vector<8x8xf32>, vector<8x16xf32>, vector<8x16xf32> -> vector<8x16xf32>
    %131 = arith.addf %126, %130 : vector<8x16xf32>
    %c21 = arith.constant 21 : index
    %c0_116 = arith.constant 0 : index
    %c0_117 = arith.constant 0 : index
    %132 = vector.load %arg6[%c21, %c0_116, %c0_117] : memref<32x8x8xf32, #tpu.memory_space<vmem>>, vector<1x8x8xf32>
    %133 = vector.shape_cast %132 : vector<1x8x8xf32> to vector<8x8xf32>
    %c0_118 = arith.constant 0 : index
    %c336 = arith.constant 336 : index
    %134 = vector.load %arg9[%c0_118, %c336] : memref<8x512xf32, #tpu.memory_space<vmem>>, vector<8x16xf32>
    %cst_119 = arith.constant dense<0.000000e+00> : vector<8x16xf32>
    %135 = tpu.matmul %133, %134, %cst_119 {dimension_numbers = #tpu.dot_dimension_numbers<[1], [0], [0], [1], [0, 0, 1, 1], [], []>} : vector<8x8xf32>, vector<8x16xf32>, vector<8x16xf32> -> vector<8x16xf32>
    %136 = arith.addf %131, %135 : vector<8x16xf32>
    %c22 = arith.constant 22 : index
    %c0_120 = arith.constant 0 : index
    %c0_121 = arith.constant 0 : index
    %137 = vector.load %arg6[%c22, %c0_120, %c0_121] : memref<32x8x8xf32, #tpu.memory_space<vmem>>, vector<1x8x8xf32>
    %138 = vector.shape_cast %137 : vector<1x8x8xf32> to vector<8x8xf32>
    %c0_122 = arith.constant 0 : index
    %c352 = arith.constant 352 : index
    %139 = vector.load %arg9[%c0_122, %c352] : memref<8x512xf32, #tpu.memory_space<vmem>>, vector<8x16xf32>
    %cst_123 = arith.constant dense<0.000000e+00> : vector<8x16xf32>
    %140 = tpu.matmul %138, %139, %cst_123 {dimension_numbers = #tpu.dot_dimension_numbers<[1], [0], [0], [1], [0, 0, 1, 1], [], []>} : vector<8x8xf32>, vector<8x16xf32>, vector<8x16xf32> -> vector<8x16xf32>
    %141 = arith.addf %136, %140 : vector<8x16xf32>
    %c23 = arith.constant 23 : index
    %c0_124 = arith.constant 0 : index
    %c0_125 = arith.constant 0 : index
    %142 = vector.load %arg6[%c23, %c0_124, %c0_125] : memref<32x8x8xf32, #tpu.memory_space<vmem>>, vector<1x8x8xf32>
    %143 = vector.shape_cast %142 : vector<1x8x8xf32> to vector<8x8xf32>
    %c0_126 = arith.constant 0 : index
    %c368 = arith.constant 368 : index
    %144 = vector.load %arg9[%c0_126, %c368] : memref<8x512xf32, #tpu.memory_space<vmem>>, vector<8x16xf32>
    %cst_127 = arith.constant dense<0.000000e+00> : vector<8x16xf32>
    %145 = tpu.matmul %143, %144, %cst_127 {dimension_numbers = #tpu.dot_dimension_numbers<[1], [0], [0], [1], [0, 0, 1, 1], [], []>} : vector<8x8xf32>, vector<8x16xf32>, vector<8x16xf32> -> vector<8x16xf32>
    %146 = arith.addf %141, %145 : vector<8x16xf32>
    %c24 = arith.constant 24 : index
    %c0_128 = arith.constant 0 : index
    %c0_129 = arith.constant 0 : index
    %147 = vector.load %arg6[%c24, %c0_128, %c0_129] : memref<32x8x8xf32, #tpu.memory_space<vmem>>, vector<1x8x8xf32>
    %148 = vector.shape_cast %147 : vector<1x8x8xf32> to vector<8x8xf32>
    %c0_130 = arith.constant 0 : index
    %c384 = arith.constant 384 : index
    %149 = vector.load %arg9[%c0_130, %c384] : memref<8x512xf32, #tpu.memory_space<vmem>>, vector<8x16xf32>
    %cst_131 = arith.constant dense<0.000000e+00> : vector<8x16xf32>
    %150 = tpu.matmul %148, %149, %cst_131 {dimension_numbers = #tpu.dot_dimension_numbers<[1], [0], [0], [1], [0, 0, 1, 1], [], []>} : vector<8x8xf32>, vector<8x16xf32>, vector<8x16xf32> -> vector<8x16xf32>
    %151 = arith.addf %146, %150 : vector<8x16xf32>
    %c25 = arith.constant 25 : index
    %c0_132 = arith.constant 0 : index
    %c0_133 = arith.constant 0 : index
    %152 = vector.load %arg6[%c25, %c0_132, %c0_133] : memref<32x8x8xf32, #tpu.memory_space<vmem>>, vector<1x8x8xf32>
    %153 = vector.shape_cast %152 : vector<1x8x8xf32> to vector<8x8xf32>
    %c0_134 = arith.constant 0 : index
    %c400 = arith.constant 400 : index
    %154 = vector.load %arg9[%c0_134, %c400] : memref<8x512xf32, #tpu.memory_space<vmem>>, vector<8x16xf32>
    %cst_135 = arith.constant dense<0.000000e+00> : vector<8x16xf32>
    %155 = tpu.matmul %153, %154, %cst_135 {dimension_numbers = #tpu.dot_dimension_numbers<[1], [0], [0], [1], [0, 0, 1, 1], [], []>} : vector<8x8xf32>, vector<8x16xf32>, vector<8x16xf32> -> vector<8x16xf32>
    %156 = arith.addf %151, %155 : vector<8x16xf32>
    %c26 = arith.constant 26 : index
    %c0_136 = arith.constant 0 : index
    %c0_137 = arith.constant 0 : index
    %157 = vector.load %arg6[%c26, %c0_136, %c0_137] : memref<32x8x8xf32, #tpu.memory_space<vmem>>, vector<1x8x8xf32>
    %158 = vector.shape_cast %157 : vector<1x8x8xf32> to vector<8x8xf32>
    %c0_138 = arith.constant 0 : index
    %c416 = arith.constant 416 : index
    %159 = vector.load %arg9[%c0_138, %c416] : memref<8x512xf32, #tpu.memory_space<vmem>>, vector<8x16xf32>
    %cst_139 = arith.constant dense<0.000000e+00> : vector<8x16xf32>
    %160 = tpu.matmul %158, %159, %cst_139 {dimension_numbers = #tpu.dot_dimension_numbers<[1], [0], [0], [1], [0, 0, 1, 1], [], []>} : vector<8x8xf32>, vector<8x16xf32>, vector<8x16xf32> -> vector<8x16xf32>
    %161 = arith.addf %156, %160 : vector<8x16xf32>
    %c27 = arith.constant 27 : index
    %c0_140 = arith.constant 0 : index
    %c0_141 = arith.constant 0 : index
    %162 = vector.load %arg6[%c27, %c0_140, %c0_141] : memref<32x8x8xf32, #tpu.memory_space<vmem>>, vector<1x8x8xf32>
    %163 = vector.shape_cast %162 : vector<1x8x8xf32> to vector<8x8xf32>
    %c0_142 = arith.constant 0 : index
    %c432 = arith.constant 432 : index
    %164 = vector.load %arg9[%c0_142, %c432] : memref<8x512xf32, #tpu.memory_space<vmem>>, vector<8x16xf32>
    %cst_143 = arith.constant dense<0.000000e+00> : vector<8x16xf32>
    %165 = tpu.matmul %163, %164, %cst_143 {dimension_numbers = #tpu.dot_dimension_numbers<[1], [0], [0], [1], [0, 0, 1, 1], [], []>} : vector<8x8xf32>, vector<8x16xf32>, vector<8x16xf32> -> vector<8x16xf32>
    %166 = arith.addf %161, %165 : vector<8x16xf32>
    %c28 = arith.constant 28 : index
    %c0_144 = arith.constant 0 : index
    %c0_145 = arith.constant 0 : index
    %167 = vector.load %arg6[%c28, %c0_144, %c0_145] : memref<32x8x8xf32, #tpu.memory_space<vmem>>, vector<1x8x8xf32>
    %168 = vector.shape_cast %167 : vector<1x8x8xf32> to vector<8x8xf32>
    %c0_146 = arith.constant 0 : index
    %c448 = arith.constant 448 : index
    %169 = vector.load %arg9[%c0_146, %c448] : memref<8x512xf32, #tpu.memory_space<vmem>>, vector<8x16xf32>
    %cst_147 = arith.constant dense<0.000000e+00> : vector<8x16xf32>
    %170 = tpu.matmul %168, %169, %cst_147 {dimension_numbers = #tpu.dot_dimension_numbers<[1], [0], [0], [1], [0, 0, 1, 1], [], []>} : vector<8x8xf32>, vector<8x16xf32>, vector<8x16xf32> -> vector<8x16xf32>
    %171 = arith.addf %166, %170 : vector<8x16xf32>
    %c29 = arith.constant 29 : index
    %c0_148 = arith.constant 0 : index
    %c0_149 = arith.constant 0 : index
    %172 = vector.load %arg6[%c29, %c0_148, %c0_149] : memref<32x8x8xf32, #tpu.memory_space<vmem>>, vector<1x8x8xf32>
    %173 = vector.shape_cast %172 : vector<1x8x8xf32> to vector<8x8xf32>
    %c0_150 = arith.constant 0 : index
    %c464 = arith.constant 464 : index
    %174 = vector.load %arg9[%c0_150, %c464] : memref<8x512xf32, #tpu.memory_space<vmem>>, vector<8x16xf32>
    %cst_151 = arith.constant dense<0.000000e+00> : vector<8x16xf32>
    %175 = tpu.matmul %173, %174, %cst_151 {dimension_numbers = #tpu.dot_dimension_numbers<[1], [0], [0], [1], [0, 0, 1, 1], [], []>} : vector<8x8xf32>, vector<8x16xf32>, vector<8x16xf32> -> vector<8x16xf32>
    %176 = arith.addf %171, %175 : vector<8x16xf32>
    %c30 = arith.constant 30 : index
    %c0_152 = arith.constant 0 : index
    %c0_153 = arith.constant 0 : index
    %177 = vector.load %arg6[%c30, %c0_152, %c0_153] : memref<32x8x8xf32, #tpu.memory_space<vmem>>, vector<1x8x8xf32>
    %178 = vector.shape_cast %177 : vector<1x8x8xf32> to vector<8x8xf32>
    %c0_154 = arith.constant 0 : index
    %c480 = arith.constant 480 : index
    %179 = vector.load %arg9[%c0_154, %c480] : memref<8x512xf32, #tpu.memory_space<vmem>>, vector<8x16xf32>
    %cst_155 = arith.constant dense<0.000000e+00> : vector<8x16xf32>
    %180 = tpu.matmul %178, %179, %cst_155 {dimension_numbers = #tpu.dot_dimension_numbers<[1], [0], [0], [1], [0, 0, 1, 1], [], []>} : vector<8x8xf32>, vector<8x16xf32>, vector<8x16xf32> -> vector<8x16xf32>
    %181 = arith.addf %176, %180 : vector<8x16xf32>
    %c31 = arith.constant 31 : index
    %c0_156 = arith.constant 0 : index
    %c0_157 = arith.constant 0 : index
    %182 = vector.load %arg6[%c31, %c0_156, %c0_157] : memref<32x8x8xf32, #tpu.memory_space<vmem>>, vector<1x8x8xf32>
    %183 = vector.shape_cast %182 : vector<1x8x8xf32> to vector<8x8xf32>
    %c0_158 = arith.constant 0 : index
    %c496 = arith.constant 496 : index
    %184 = vector.load %arg9[%c0_158, %c496] : memref<8x512xf32, #tpu.memory_space<vmem>>, vector<8x16xf32>
    %cst_159 = arith.constant dense<0.000000e+00> : vector<8x16xf32>
    %185 = tpu.matmul %183, %184, %cst_159 {dimension_numbers = #tpu.dot_dimension_numbers<[1], [0], [0], [1], [0, 0, 1, 1], [], []>} : vector<8x8xf32>, vector<8x16xf32>, vector<8x16xf32> -> vector<8x16xf32>
    %186 = arith.addf %181, %185 : vector<8x16xf32>
    %c0_160 = arith.constant 0 : index
    %c0_161 = arith.constant 0 : index
    %187 = vector.load %arg7[%c0_160, %c0_161] : memref<8x1xf32, #tpu.memory_space<vmem>>, vector<8x1xf32>
    %188 = vector.broadcast %187 : vector<8x1xf32> to vector<8x16xf32>
    %189 = arith.addf %186, %188 : vector<8x16xf32>
    %c0_162 = arith.constant 0 : index
    %c0_163 = arith.constant 0 : index
    %c0_164 = arith.constant 0 : index
    %190 = vector.load %arg8[%c0_162, %c0_163, %c0_164] : memref<1x8x16xf32, #tpu.memory_space<vmem>>, vector<1x8x16xf32>
    %191 = vector.shape_cast %190 : vector<1x8x16xf32> to vector<8x16xf32>
    %192 = vector.shape_cast %189 : vector<8x16xf32> to vector<1x8x16xf32>
    tpu.vector_store %arg8[%c0_162, %c0_163, %c0_164], %192 {strides = array<i32>} : memref<1x8x16xf32, #tpu.memory_space<vmem>>, vector<1x8x16xf32>,
    return
  }
  func.func @transform_0(%arg0: i32) -> (i32, i32, i32) {
    %c0_i32 = arith.constant 0 : i32
    %c0_i32_0 = arith.constant 0 : i32
    %c0_i32_1 = arith.constant 0 : i32
    return %arg0, %c0_i32, %c0_i32_0 : i32, i32, i32
  }
  func.func @transform_1(%arg0: i32) -> (i32, i32, i32) {
    %c0_i32 = arith.constant 0 : i32
    %c0_i32_0 = arith.constant 0 : i32
    %c0_i32_1 = arith.constant 0 : i32
    %c0_i32_2 = arith.constant 0 : i32
    return %c0_i32, %c0_i32_0, %c0_i32_1 : i32, i32, i32
  }
  func.func @transform_2(%arg0: i32) -> (i32, i32) {
    %c0_i32 = arith.constant 0 : i32
    %c0_i32_0 = arith.constant 0 : i32
    %c0_i32_1 = arith.constant 0 : i32
    return %c0_i32, %c0_i32_0 : i32, i32
  }
  func.func @transform_3(%arg0: i32) -> (i32, i32) {
    %c0_i32 = arith.constant 0 : i32
    %c0_i32_0 = arith.constant 0 : i32
    %c0_i32_1 = arith.constant 0 : i32
    return %c0_i32, %c0_i32_0 : i32, i32
  }
  func.func @transform_4(%arg0: i32) -> (i32, i32) {
    %c0_i32 = arith.constant 0 : i32
    %c0_i32_0 = arith.constant 0 : i32
    %c0_i32_1 = arith.constant 0 : i32
    return %c0_i32, %c0_i32_0 : i32, i32
  }
  func.func @transform_5(%arg0: i32) -> (i32, i32, i32) {
    %c0_i32 = arith.constant 0 : i32
    %c0_i32_0 = arith.constant 0 : i32
    %c0_i32_1 = arith.constant 0 : i32
    %c0_i32_2 = arith.constant 0 : i32
    return %c0_i32, %c0_i32_0, %c0_i32_1 : i32, i32, i32
  }
  func.func @transform_6(%arg0: i32) -> (i32, i32) {
    %c0_i32 = arith.constant 0 : i32
    %c0_i32_0 = arith.constant 0 : i32
    %c0_i32_1 = arith.constant 0 : i32
    return %c0_i32, %c0_i32_0 : i32, i32
  }
  func.func @transform_7(%arg0: i32) -> (i32, i32, i32) {
    %c0_i32 = arith.constant 0 : i32
    %c0_i32_0 = arith.constant 0 : i32
    %c0_i32_1 = arith.constant 0 : i32
    return %arg0, %c0_i32, %c0_i32_0 : i32, i32, i32
  }
}

</mosaic_0001>

<bundles_post_ra>
// kernel: tpu_custom_call.1
= control target key start
LH: loop header
LB: loop body
LE: loop exit
PB: predicated region body
PF: predicated region fallthrough
CT: control target
= control target key end

     0   :  { %12 = vsyncpa [#allocation4], 0  ;;  %s2160_s0 = inlined_call_operand.vmem [shape: f32[2,10,64], index: 0, kind: input, shape index: {}]   ;;  %s2161_s1 = inlined_call_operand.vmem [shape: f32[3,64,32], index: 1, kind: input, shape index: {}]   ;;  %s2162_s2 = inlined_call_operand.vmem [shape: f32[1,32], index: 2, kind: input, shape index: {}]   ;;  %s2163_s3 = inlined_call_operand.vmem [shape: f32[32,512], index: 3, kind: input, shape index: {}]   ;;  %s2164_s4 = inlined_call_operand.vmem [shape: f32[1,512], index: 4, kind: input, shape index: {}]   ;;  %s2165_s5 = inlined_call_operand.vmem [shape: f32[32,8,8], index: 5, kind: input, shape index: {}]   ;;  %s2166_s6 = inlined_call_operand.vmem [shape: f32[8,1], index: 6, kind: input, shape index: {}]   ;;  %s2167_s7 = inlined_call_operand.hbm [shape: f32[2,8,16], index: 7, kind: output, shape index: {}]  }
   0x1   :  { %14 = vsyncpa [#allocation4 + $0x1], 0  ;;  %s1773_s24 = smov 0   ;;  %s1775_s25 = smov 0  }
   0x2   :  { %s1777_s26 = smov 0   ;;  %s1779_s27 = smov 0  }
   0x3 LB: > { %s1794_s28 = sadd.s32 4294967295, %s1723_s27   ;;  %s1503_s29 = sadd.s32 4294967294, %s1723_s27   ;;  %s1723_s27 = sphi %s1779_s27, %s2173_s27   ;;  %s1719_s26 = sphi %s1777_s26, %s2172_s26   ;;  %s1715_s25 = sphi %s1775_s25, %s2171_s25   ;;  %s1711_s24 = sphi %s1773_s24, %s2170_s24  }
   0x4   : > { %s1798_s30 = sadd.s32 1, %s1723_s27   ;;  %s179_s8 = sadd.s32 1, %s1719_s26 }
   0x5   : > { %s176_s9 = ssub.s32 %s1723_s27, %s1798_s30  ;;  %p189_p0 = scmp.ne.s32.totalorder %s1719_s26, %s1715_s25 }
   0x6   : > { %p177_p1 = scmp.eq.s32.totalorder %s176_s9, 0  ;;  %p190_p2 = scmp.eq.s32.totalorder %s1794_s28, 1 }
   0x7   : > { %p195_p3 = scmp.ne.s32.totalorder %s1715_s25, %s1711_s24  ;;  %p196_p4 = scmp.eq.s32.totalorder %s1503_s29, 1 }
   0x8   : > { %s1809_s10 = scalar_select %p177_p1, %s1719_s26, %s179_s8  }
   0x9   : > { %p1811_p5 = por %p190_p2, %p189_p0  ;;  %p1815_p6 = por %p196_p4, %p195_p3 }
   0xa   : > { %p1506_p7 = scmp.ge.s32.totalorder %s1723_s27, 1  ;;  %p240_p8 = scmp.lt.s32.totalorder %s1723_s27, 3 }
   0xc   : > { %p241_p9 = pnand %p1506_p7, %p240_p8 }
   0xd   : > { %p272_p10 = scmp.lt.s32.totalorder (!%p241_p9), %s1794_s28, 1  ;;  %s1725_s20 = smov (!%p241_p9), 80  }
   0xe   : > { %244 = sbr.rel (%p241_p9) target bundleno = 628 (0x274), region = 48  ;;  %s1726_s21 = smov (!%p241_p9), 48  }
   0xf   : > { %s1727_s22 = smov (!%p241_p9), 112   ;;  %s1728_s23 = smov (!%p241_p9), 32  }
  0x10   : > { %s1730_s29 = smov (!%p241_p9), 64   ;;  %s1731_s8 = smov (!%p241_p9), 16  }
  0x13   : > { %v1527_v0 = vld [vmem:[%s2161_s1 + $0xb8] sm:$0xff]  ;;  %v1526_v1 = vld [vmem:[%s2161_s1 + $0xb0] sm:$0xff]  ;;  %v1525_v5 = vld [vmem:[%s2161_s1 + $0xa8] sm:$0xff]  ;;  %s273_s17 = scalar_select %p272_p10, %s1794_s28, 1  ;;  %vm296_vm0 = vcmask 523264   ;;  %vm409_vm1 = vcmask 261120  }
  0x14   : > { %v1517_v2 = vld [vmem:[%s2161_s1 + $0x78] sm:$0xff]  ;;  %364 = vmatpush.msra.mxu2 %v1527_v0  ;;  %v1516_v4 = vld [vmem:[%s2161_s1 + $0x70] sm:$0xff]  ;;  %v1515_v7 = vld [vmem:[%s2161_s1 + $0x68] sm:$0xff]  ;;  %vm505_vm2 = vcmask 64512   ;;  %vm1426_vm3 = vcmask 130048  }
  0x15   : > { %308 = vmatpush.msra.mxu0 %v1517_v2  ;;  %v285_v3 = vld [vmem:[%s2161_s1 + $0x38] sm:$0xff]  ;;  %v284_v6 = vld [vmem:[%s2161_s1 + $0x30] sm:$0xff]  ;;  %v283_v8 = vld [vmem:[%s2161_s1 + $0x28] sm:$0xff]  ;;  %s1600_s16 = sshll.u32 %s273_s17, 4 }
  0x16   : > { %331 = vmatpush.msra.mxu1 %v285_v3  ;;  %365 = vmatpush.msra.mxu2 %v1526_v1  ;;  %v1524_v9 = vld [vmem:[%s2161_s1 + $0xa0] sm:$0xff]  ;;  %v1523_v12 = vld [vmem:[%s2161_s1 + $0x98] sm:$0xff]  ;;  %v1522_v15 = vld [vmem:[%s2161_s1 + $0x90] sm:$0xff]  ;;  %s276_s13 = scalar_lea.vmem %s2160_s0, %s1600_s16  ;;  %s1729_s16 = smov 96  }
  0x17   : > { %309 = vmatpush.msra.mxu0 %v1516_v4  ;;  %v1514_v10 = vld [vmem:[%s2161_s1 + $0x60] sm:$0xff]  ;;  %v1513_v13 = vld [vmem:[%s2161_s1 + $0x58] sm:$0xff]  ;;  %v1512_v16 = vld [vmem:[%s2161_s1 + $0x50] sm:$0xff] }
  0x18   : > { %332 = vmatpush.msra.mxu1 %v284_v6  ;;  %366 = vmatpush.msra.mxu2 %v1525_v5  ;;  %v282_v11 = vld [vmem:[%s2161_s1 + $0x20] sm:$0xff]  ;;  %v281_v14 = vld [vmem:[%s2161_s1 + $0x18] sm:$0xff]  ;;  %v280_v17 = vld [vmem:[%s2161_s1 + $0x10] sm:$0xff] }
  0x19   : > { %310 = vmatpush.msra.mxu0 %v1515_v7  ;;  %v1521_v18 = vld [vmem:[%s2161_s1 + $0x88] sm:$0xff]  ;;  %v1520_v21 = vld [vmem:[%s2161_s1 + $0x80] sm:$0xff]  ;;  %v397_v28 = vld [vmem:[%s2163_s3 + $0x70] sm:$0xff] }
  0x1a   : > { %333 = vmatpush.msra.mxu1 %v283_v8  ;;  %367 = vmatpush.msra.mxu2 %v1524_v9  ;;  %v1511_v19 = vld [vmem:[%s2161_s1 + $0x48] sm:$0xff]  ;;  %v1510_v22 = vld [vmem:[%s2161_s1 + $0x40] sm:$0xff]  ;;  %v398_v29 = vld [vmem:[%s2163_s3 + $0x78] sm:$0xff] }
  0x1b   : > { %311 = vmatpush.msra.mxu0 %v1514_v10  ;;  %v279_v20 = vld [vmem:[%s2161_s1 + $0x8] sm:$0xff]  ;;  %v278_v24 = vld [vmem:[%s2161_s1] sm:$0xff]  ;;  %v393_v31 = vld [vmem:[%s2163_s3 + $0x50] sm:$0xff] }
  0x1c   : > { %334 = vmatpush.msra.mxu1 %v282_v11  ;;  %368 = vmatpush.msra.mxu2 %v1523_v12  ;;  %v343_v23 = vld [vmem:[%s276_s13 + $0x2] sm:$0xff]  ;;  %v394_v32 = vld [vmem:[%s2163_s3 + $0x58] sm:$0xff]  ;;  %v389_v34 = vld [vmem:[%s2163_s3 + $0x30] sm:$0xff] }
  0x1d   : > { %312 = vmatpush.msra.mxu0 %v1513_v13  ;;  %v286_v25 = vld [vmem:[%s276_s13 + $0x1] sm:$0xff]  ;;  %v390_v35 = vld [vmem:[%s2163_s3 + $0x38] sm:$0xff]  ;;  %v385_v37 = vld [vmem:[%s2163_s3 + $0x10] sm:$0xff] }
  0x1e   : > { %335 = vmatpush.msra.mxu1 %v281_v14  ;;  %369 = vmatpush.msra.mxu2 %v1522_v15  ;;  %v277_v26 = vld [vmem:[%s276_s13] sm:$0xff]  ;;  %v386_v38 = vld [vmem:[%s2163_s3 + $0x18] sm:$0xff]  ;;  %v396_v39 = vld [vmem:[%s2163_s3 + $0x68] sm:$0xff] }
  0x1f   : > { %313 = vmatpush.msra.mxu0 %v1512_v16  ;;  %v395_v27 = vld [vmem:[%s2163_s3 + $0x60] sm:$0xff]  ;;  %v392_v40 = vld [vmem:[%s2163_s3 + $0x48] sm:$0xff]  ;;  %v1538_v3 = vld [vmem:[%s2165_s5 + $0x18] sm:$0xff] }
  0x20   : > { %336 = vmatpush.msra.mxu1 %v280_v17  ;;  %370 = vmatpush.msra.mxu2 %v1521_v18  ;;  %v391_v30 = vld [vmem:[%s2163_s3 + $0x40] sm:$0xff]  ;;  %v388_v41 = vld [vmem:[%s2163_s3 + $0x28] sm:$0xff]  ;;  %v1536_v15 = vld [vmem:[%s2165_s5 + $0x10] sm:$0xff] }
  0x21   : > { %314 = vmatpush.msra.mxu0 %v1511_v19  ;;  %425 = vmatpush.msra.mxu3 %v395_v27  ;;  %v387_v33 = vld [vmem:[%s2163_s3 + $0x20] sm:$0xff]  ;;  %v384_v42 = vld [vmem:[%s2163_s3 + $0x8] sm:$0xff]  ;;  %v1546_v19 = vld [vmem:[%s2165_s5 + $0x38] sm:$0xff] }
  0x22   : > { %337 = vmatpush.msra.mxu1 %v279_v20  ;;  %371 = vmatpush.msra.mxu2 %v1520_v21  ;;  %v383_v36 = vld [vmem:[%s2163_s3] sm:$0xff]  ;;  %v1542_v5 = vld [vmem:[%s2165_s5 + $0x28] sm:$0xff] }
  0x23   : > { %315 = vmatpush.msra.mxu0 %v1510_v22  ;;  %1528 = vmatmul.msk.f32.vlgmr.msra.gmra.mxu2 %vm296_vm0, %v343_v23  ;;  %v1660_v46 = vld [vmem:[%s2162_s2] ss:$0 sm:$0xff]  ;;  %v1533_v7 = vld [vmem:[%s2165_s5 + $0x8] sm:$0xff]  ;;  %v1544_v23 = vld [vmem:[%s2165_s5 + $0x30] sm:$0xff] }
  0x24   : > { %338 = vmatpush.msra.mxu1 %v278_v24  ;;  %1518 = vmatmul.msk.f32.vlgmr.msra.gmra.mxu0 %vm296_vm0, %v286_v25  ;;  %v399_v51 = vld [vmem:[%s2164_s4] sm:$0xf]  ;;  %v1550_v22 = vld [vmem:[%s2165_s5 + $0x48] sm:$0xff] }
  0x25   : > { %1519 = vmatmul.msk.f32.vlgmr.msra.gmra.mxu1 %vm296_vm0, %v277_v26  ;;  %465 = vmatpush.msrb.mxu0 %v397_v28  ;;  %v401_v52 = vperm.slane %v399_v51, 0  ;;  %v402_v55 = vperm.slane %v399_v51, 1  ;;  %v403_v59 = vperm.slane %v399_v51, 2  ;;  %v404_v62 = vperm.slane %v399_v51, 3  ;;  %v497_v1 = vld [vmem:[%s2165_s5] sm:$0xff]  ;;  %v1554_v26 = vld [vmem:[%s2165_s5 + $0x58] sm:$0xff] }
  0x26   : > { %485 = vmatpush.msrb.mxu1 %v398_v29  ;;  %426 = vmatpush.msra.mxu3 %v391_v30  ;;  %v1540_v16 = vld [vmem:[%s2165_s5 + $0x20] sm:$0xff]  ;;  %v1558_v29 = vld [vmem:[%s2165_s5 + $0x68] sm:$0xff]  ;;  %v1552_v30 = vld [vmem:[%s2165_s5 + $0x50] sm:$0xff] }
  0x27   : > { %466 = vmatpush.msrb.mxu0 %v393_v31  ;;  %v1548_v24 = vld [vmem:[%s2165_s5 + $0x40] sm:$0xff]  ;;  %v1578_v51 = vld [vmem:[%s2165_s5 + $0xb8] sm:$0xff] }
  0x28   : > { %486 = vmatpush.msrb.mxu1 %v394_v32  ;;  %427 = vmatpush.msra.mxu3 %v387_v33  ;;  %v1556_v31 = vld [vmem:[%s2165_s5 + $0x60] sm:$0xff]  ;;  %v1562_v33 = vld [vmem:[%s2165_s5 + $0x78] sm:$0xff] }
  0x29   : > { %467 = vmatpush.msrb.mxu0 %v389_v34 }
  0x2a   : > { %487 = vmatpush.msrb.mxu1 %v390_v35  ;;  %428 = vmatpush.msra.mxu3 %v383_v36  ;;  %v1566_v36 = vld [vmem:[%s2165_s5 + $0x88] sm:$0xff] }
  0x2b   : > { %468 = vmatpush.msrb.mxu0 %v385_v37  ;;  %v1560_v37 = vld [vmem:[%s2165_s5 + $0x70] sm:$0xff] }
  0x2c   : > { %488 = vmatpush.msrb.mxu1 %v386_v38  ;;  %445 = vmatpush.msrb.mxu3 %v396_v39  ;;  %v1564_v38 = vld [vmem:[%s2165_s5 + $0x80] sm:$0xff] }
  0x2d   : > { %v1419_v39 = vld [vmem:[%s2166_s6] sm:$0xff] }
  0x2e   : > { %446 = vmatpush.msrb.mxu3 %v392_v40  ;;  %v1732_v40 = vmov 0  }
  0x2f   : > { %1658 = vset.pattern.permute.xlu2 %v1732_v40  ;;  %1659 = vset.pattern.permute.xlu0 %v1732_v40 }
  0x30   : > { %447 = vmatpush.msrb.mxu3 %v388_v41 }
  0x32   : > { %448 = vmatpush.msrb.mxu3 %v384_v42  ;;  %v1570_v42 = vld [vmem:[%s2165_s5 + $0x98] sm:$0xff] }
  0xa1   : > { %v317_v43 = vpop.f32.mrf.mxu0 }
  0xa2   : > { %v340_v44 = vpop.f32.mrf.mxu1 }
  0xa3   : > { %v341_v45 = vadd.f32 %v340_v44, %v317_v43 }
  0xa6   : > { %v373_v47 = vpop.f32.mrf.mxu2 }
  0xa7   : > { %v376_v48 = vadd.f32 %v373_v47, %v341_v45  ;;  %v1574_v45 = vld [vmem:[%s2165_s5 + $0xa8] sm:$0xff]  ;;  %v1572_v47 = vld [vmem:[%s2165_s5 + $0xa0] sm:$0xff] }
  0xa9   : > { %v381_v49 = vadd.f32 %v1660_v46, %v376_v48  ;;  %v1568_v46 = vld [vmem:[%s2165_s5 + $0x90] sm:$0xff] }
  0xab   : > { %v382_v50 = vmax.f32 %v381_v49, 0.0 }
  0xad   : > { %1529 = vmatmul.msk.f32.vlgmr.msra.gmra.mxu3 %vm409_vm1, %v382_v50  ;;  %1531 = vmatmul.msk.f32.vlgmr.msrb.gmra.mxu0 %vm409_vm1, %v382_v50 }
  0xae   : > { %1532 = vmatmul.msk.f32.vlgmr.msrb.gmra.mxu1 %vm409_vm1, %v382_v50 }
  0xb5   : > { %1530 = vmatmul.msk.f32.vlgmr.msrb.gmra.mxu3 %vm409_vm1, %v382_v50  ;;  %v1582_v50 = vld [vmem:[%s2165_s5 + $0xc8] sm:$0xff] }
 0x12a   : > { %v470_v60 = vpop.f32.mrf.mxu0 }
 0x12b   : > { %v1963_v61 = vadd.f32 %v470_v60, %v403_v59  ;;  %v490_v63 = vpop.f32.mrf.mxu1  ;;  %v1584_v59 = vld [vmem:[%s2165_s5 + $0xd0] sm:$0xff]  ;;  %v1588_v60 = vld [vmem:[%s2165_s5 + $0xe0] sm:$0xff] }
 0x12c   : > { %v1980_v0 = vadd.f32 %v490_v63, %v404_v62  ;;  %v1594_v63 = vld [vmem:[%s2165_s5 + $0xf8] sm:$0xff] }
 0x130   : > { %v430_v53 = vpop.f32.mrf.mxu3 }
 0x131   : > { %v431_v54 = vadd.f32 %v430_v53, %v401_v52  ;;  %v1576_v53 = vld [vmem:[%s2165_s5 + $0xb0] sm:$0xff] }
 0x133   : > { %583 = vrot.lane.b32.xlu2 %v431_v54, %s1725_s20  ;;  %641 = vrot.lane.b32.xlu1 %v431_v54, %s1726_s21 }
 0x134   : > { %502 = vrot.lane.b32.xlu0 %v431_v54, %s1727_s22  ;;  %547 = vmatpush.msra.mxu3 %v431_v54 }
 0x135   : > { %1535 = vmatmul.msk.f32.vlgmr.msra.gmra.mxu3 %vm505_vm2, %v497_v1 }
 0x138   : > { %v450_v56 = vpop.f32.mrf.mxu3 }
 0x139   : > { %v1955_v57 = vadd.f32 %v450_v56, %v402_v55 }
 0x13b   : > { %670 = vrot.lane.b32.xlu2 %v431_v54, %s1728_s23  ;;  %v1653_v58 = vpack.i.bf16 %v1955_v57, %v431_v54 }
 0x13d   : > { %1654 = vrot.lane.b32.xlu1 %v1653_v58, %s1729_s16  ;;  %1649 = vrot.lane.b32.xlu0 %v1653_v58, %s1730_s29  ;;  %v1586_v58 = vld [vmem:[%s2165_s5 + $0xd8] sm:$0xff] }
 0x143   : > { %872 = vrot.lane.b32.xlu2 %v1955_v57, %s1726_s21 }
 0x145   : > { %699 = vrot.lane.b32.xlu1 %v431_v54, %s1731_s8  ;;  %756 = vrot.lane.b32.xlu0 %v1955_v57, %s1727_s22  ;;  %v1580_v54 = vld [vmem:[%s2165_s5 + $0xc0] sm:$0xff] }
 0x14b   : > { %987 = vrot.lane.b32.xlu2 %v1963_v61, %s1727_s22 }
 0x14d   : > { %1074 = vrot.lane.b32.xlu1 %v1963_v61, %s1730_s29  ;;  %814 = vrot.lane.b32.xlu0 %v1955_v57, %s1725_s20 }
 0x153   : > { %1016 = vrot.lane.b32.xlu2 %v1963_v61, %s1729_s16 }
 0x155   : > { %901 = vrot.lane.b32.xlu1 %v1955_v57, %s1728_s23  ;;  %930 = vrot.lane.b32.xlu0 %v1955_v57, %s1731_s8 }
 0x15b   : > { %1132 = vrot.lane.b32.xlu2 %v1963_v61, %s1728_s23 }
 0x15d   : > { %1045 = vrot.lane.b32.xlu1 %v1963_v61, %s1725_s20  ;;  %1103 = vrot.lane.b32.xlu0 %v1963_v61, %s1726_s21 }
 0x163   : > { %1305 = vrot.lane.b32.xlu2 %v1980_v0, %s1730_s29  ;;  %s1597_s29 = sshll.u32 %s1794_s28, 3 }
 0x164   : > { %s1439_s9 = scalar_lea.hbm %s2167_s7, %s1597_s29 }
 0x165   : > { %1161 = vrot.lane.b32.xlu1 %v1963_v61, %s1731_s8  ;;  %1218 = vrot.lane.b32.xlu0 %v1980_v0, %s1727_s22  ;;  %s1443_s18 = sshll.u32 %s1439_s9, 4  ;;  %s1681_s22 = scalar_lea.hbm %s2167_s7, 16  ;;  %s1444_s18 = int_to_ptr.hbm [resolvable:$true] %s1443_s18 }
 0x166   : > { %s1675_s13 = sshra.s32 %s1444_s18, 4  ;;  %s1676_s13 = int_to_ptr.hbm [resolvable:$true] %s1675_s13 }
 0x167   : > { %s1677_s19 = scalar_lea.hbm %s1676_s13, 8  ;;  %p1682_p0 = scmp.lt.s32.totalorder %s1676_s13, %s2167_s7 }
 0x168   : > { %p1678_p11 = scmp.ne.s32.totalorder %s1676_s13, %s1677_s19  ;;  %p1683_p1 = scmp.lt.s32.totalorder %s1681_s22, %s1677_s19 }
 0x16a   : > { %p1679_p12 = pnand %p1678_p11, %p1811_p5  ;;  %p1684_p2 = por %p1683_p1, %p1682_p0 }
 0x16b   : > { %1276 = vrot.lane.b32.xlu2 %v1980_v0, %s1725_s20 }
 0x16c   : > { %p1680_p13 = pneg %p1679_p12 }
 0x16d   : > { %1334 = vrot.lane.b32.xlu1 %v1980_v0, %s1726_s21  ;;  %1247 = vrot.lane.b32.xlu0 %v1980_v0, %s1729_s16 }
 0x16e   : > { %p1685_p3 = pnand %p1684_p2, %p1680_p13 }
 0x173   : > { %1422 = vperm.xlu2 %1658, %v1419_v39  }
 0x175   : > { %1392 = vrot.lane.b32.xlu1 %v1980_v0, %s1731_s8  ;;  %1363 = vrot.lane.b32.xlu0 %v1980_v0, %s1728_s23  ;;  %s269_s23 = sand.u32 1, %s1715_s25  }
 0x176   : > { %s1507_s16 = sshll.u32 %s269_s23, 3  ;;  %s1429_s28 = scalar_lea.sflag [#allocation4], %s269_s23 }
 0x177   : > { %s271_s14 = scalar_lea.vmem [#allocation3], %s1507_s16 }
 0x178   : > { %s1441_s15 = sshll.u32 %s271_s14, 4  ;;  %s1442_s15 = int_to_ptr.vmem [resolvable:$true] %s1441_s15 }
 0x18d   : > { %v584_v2 = vpop.permute.xlu2 %583 }
 0x18e   : > { %604 = vmatpush.msra.mxu1 %v584_v2 }
 0x18f   : > { %1539 = vmatmul.msk.f32.vlgmr.msra.gmra.mxu1 %vm505_vm2, %v1538_v3 }
 0x195   : > { %v671_v4 = vpop.permute.xlu2 %670 }
 0x19d   : > { %v873_v8 = vpop.permute.xlu2 %872 }
 0x1a5   : > { %v642_v6 = vpop.permute.xlu1 %641  ;;  %v988_v12 = vpop.permute.xlu2 %987 }
 0x1a6   : > { %v503_v9 = vpop.permute.xlu0 %502  ;;  %662 = vmatpush.msrb.mxu3 %v642_v6 }
 0x1a7   : > { %524 = vmatpush.msrb.mxu2 %v503_v9  ;;  %1543 = vmatmul.msk.f32.vlgmr.msrb.gmra.mxu3 %vm505_vm2, %v1542_v5 }
 0x1a8   : > { %1534 = vmatmul.msk.f32.vlgmr.msrb.gmra.mxu2 %vm505_vm2, %v1533_v7 }
 0x1ad   : > { %v1017_v25 = vpop.permute.xlu2 %1016 }
 0x1af   : > { %v1655_v10 = vpop.permute.xlu1 %1654  ;;  %v1650_v11 = vpop.permute.xlu0 %1649 }
 0x1b0   : > { %v1656_v13 = vunpack.i.l.bf16 %v1655_v10  ;;  %v1651_v14 = vunpack.i.l.bf16 %v1650_v11  ;;  %v1657_v17 = vunpack.i.h.bf16 %v1655_v10  ;;  %v1652_v18 = vunpack.i.h.bf16 %v1650_v11 }
 0x1b2   : > { %575 = vmatpush.msra.mxu0 %v1656_v13  ;;  %633 = vmatpush.msra.mxu2 %v1651_v14 }
 0x1b3   : > { %1537 = vmatmul.msk.f32.vlgmr.msra.gmra.mxu0 %vm505_vm2, %v1536_v15  ;;  %1541 = vmatmul.msk.f32.vlgmr.msra.gmra.mxu2 %vm505_vm2, %v1540_v16 }
 0x1b4   : > { %691 = vmatpush.msrb.mxu0 %v671_v4  ;;  %747 = vmatpush.msrb.mxu2 %v1955_v57  ;;  %v1590_v57 = vld [vmem:[%s2165_s5 + $0xe8] sm:$0xff] }
 0x1b5   : > { %v1133_v32 = vpop.permute.xlu2 %1132 }
 0x1b6   : > { %806 = vmatpush.msra.mxu0 %v1657_v17  ;;  %864 = vmatpush.msra.mxu2 %v1652_v18 }
 0x1b7   : > { %v700_v20 = vpop.permute.xlu1 %699  ;;  %v757_v21 = vpop.permute.xlu0 %756 }
 0x1b8   : > { %720 = vmatpush.msrb.mxu1 %v700_v20  ;;  %777 = vmatpush.msra.mxu3 %v757_v21  ;;  %v549_v1 = vpop.f32.mrf.mxu3 }
 0x1b9   : > { %1547 = vmatmul.msk.f32.vlgmr.msrb.gmra.mxu1 %vm505_vm2, %v1546_v19  ;;  %1551 = vmatmul.msk.f32.vlgmr.msra.gmra.mxu3 %vm505_vm2, %v1550_v22 }
 0x1ba   : > { %893 = vmatpush.msrb.mxu3 %v873_v8 }
 0x1bb   : > { %1545 = vmatmul.msk.f32.vlgmr.msrb.gmra.mxu0 %vm505_vm2, %v1544_v23  ;;  %1549 = vmatmul.msk.f32.vlgmr.msrb.gmra.mxu2 %vm505_vm2, %v1548_v24 }
 0x1bc   : > { %1008 = vmatpush.msra.mxu3 %v988_v12  ;;  %978 = vmatpush.msrb.mxu2 %v1963_v61 }
 0x1bd   : > { %v1306_v41 = vpop.permute.xlu2 %1305 }
 0x1bf   : > { %v1075_v27 = vpop.permute.xlu1 %1074  ;;  %v815_v28 = vpop.permute.xlu0 %814 }
 0x1c0   : > { %835 = vmatpush.msra.mxu1 %v815_v28 }
 0x1c1   : > { %1555 = vmatmul.msk.f32.vlgmr.msra.gmra.mxu1 %vm505_vm2, %v1554_v26  ;;  %1559 = vmatmul.msk.f32.vlgmr.msrb.gmra.mxu3 %vm505_vm2, %v1558_v29 }
 0x1c3   : > { %1553 = vmatmul.msk.f32.vlgmr.msra.gmra.mxu0 %vm505_vm2, %v1552_v30  ;;  %1557 = vmatmul.msk.f32.vlgmr.msra.gmra.mxu2 %vm505_vm2, %v1556_v31 }
 0x1c4   : > { %1095 = vmatpush.msra.mxu2 %v1075_v27 }
 0x1c5   : > { %v1277_v52 = vpop.permute.xlu2 %1276 }
 0x1c7   : > { %v902_v34 = vpop.permute.xlu1 %901  ;;  %v931_v35 = vpop.permute.xlu0 %930 }
 0x1c8   : > { %922 = vmatpush.msrb.mxu0 %v902_v34  ;;  %951 = vmatpush.msrb.mxu1 %v931_v35 }
 0x1c9   : > { %1563 = vmatmul.msk.f32.vlgmr.msrb.gmra.mxu1 %vm505_vm2, %v1562_v33  ;;  %1567 = vmatmul.msk.f32.vlgmr.msra.gmra.mxu3 %vm505_vm2, %v1566_v36 }
 0x1ca   : > { %1037 = vmatpush.msra.mxu0 %v1017_v25 }
 0x1cb   : > { %1561 = vmatmul.msk.f32.vlgmr.msrb.gmra.mxu0 %vm505_vm2, %v1560_v37  ;;  %1565 = vmatmul.msk.f32.vlgmr.msrb.gmra.mxu2 %vm505_vm2, %v1564_v38 }
 0x1cc   : > { %1153 = vmatpush.msrb.mxu0 %v1133_v32  ;;  %1209 = vmatpush.msrb.mxu2 %v1980_v0  ;;  %v1592_v0 = vld [vmem:[%s2165_s5 + $0xf0] sm:$0xff] }
 0x1cf   : > { %v1046_v43 = vpop.permute.xlu1 %1045  ;;  %v1104_v44 = vpop.permute.xlu0 %1103 }
 0x1d0   : > { %1066 = vmatpush.msra.mxu1 %v1046_v43  ;;  %1124 = vmatpush.msrb.mxu3 %v1104_v44 }
 0x1d1   : > { %1571 = vmatmul.msk.f32.vlgmr.msra.gmra.mxu1 %vm505_vm2, %v1570_v42  ;;  %1575 = vmatmul.msk.f32.vlgmr.msrb.gmra.mxu3 %vm505_vm2, %v1574_v45 }
 0x1d3   : > { %1569 = vmatmul.msk.f32.vlgmr.msra.gmra.mxu0 %vm505_vm2, %v1568_v46  ;;  %1573 = vmatmul.msk.f32.vlgmr.msra.gmra.mxu2 %vm505_vm2, %v1572_v47 }
 0x1d4   : > { %1326 = vmatpush.msra.mxu2 %v1306_v41 }
 0x1d7   : > { %v1162_v48 = vpop.permute.xlu1 %1161  ;;  %v1219_v49 = vpop.permute.xlu0 %1218 }
 0x1d8   : > { %1182 = vmatpush.msrb.mxu1 %v1162_v48  ;;  %1239 = vmatpush.msra.mxu3 %v1219_v49 }
 0x1d9   : > { %1583 = vmatmul.msk.f32.vlgmr.msra.gmra.mxu3 %vm505_vm2, %v1582_v50  ;;  %1579 = vmatmul.msk.f32.vlgmr.msrb.gmra.mxu1 %vm505_vm2, %v1578_v51 }
 0x1da   : > { %1297 = vmatpush.msra.mxu1 %v1277_v52 }
 0x1db   : > { %1577 = vmatmul.msk.f32.vlgmr.msrb.gmra.mxu0 %vm505_vm2, %v1576_v53  ;;  %1581 = vmatmul.msk.f32.vlgmr.msrb.gmra.mxu2 %vm505_vm2, %v1580_v54 }
 0x1df   : > { %v1335_v55 = vpop.permute.xlu1 %1334  ;;  %v1248_v56 = vpop.permute.xlu0 %1247 }
 0x1e0   : > { %1268 = vmatpush.msra.mxu0 %v1248_v56  ;;  %1355 = vmatpush.msrb.mxu3 %v1335_v55 }
 0x1e1   : > { %1591 = vmatmul.msk.f32.vlgmr.msrb.gmra.mxu3 %vm505_vm2, %v1590_v57  ;;  %1587 = vmatmul.msk.f32.vlgmr.msra.gmra.mxu1 %vm505_vm2, %v1586_v58 }
 0x1e3   : > { %1585 = vmatmul.msk.f32.vlgmr.msra.gmra.mxu0 %vm505_vm2, %v1584_v59  ;;  %1589 = vmatmul.msk.f32.vlgmr.msra.gmra.mxu2 %vm505_vm2, %v1588_v60 }
 0x1e7   : > { %v1393_v61 = vpop.permute.xlu1 %1392  ;;  %v1364_v62 = vpop.permute.xlu0 %1363 }
 0x1e8   : > { %1384 = vmatpush.msrb.mxu0 %v1364_v62  ;;  %1413 = vmatpush.msrb.mxu1 %v1393_v61 }
 0x1e9   : > { %1595 = vmatmul.msk.f32.vlgmr.msrb.gmra.mxu1 %vm505_vm2, %v1594_v63  ;;  %v1423_v63 = vpop.permute.xlu2 %1422 }
 0x1eb   : > { %1593 = vmatmul.msk.f32.vlgmr.msrb.gmra.mxu0 %vm505_vm2, %v1592_v0 }
 0x20c   : > { %v606_v4 = vpop.f32.mrf.mxu1 }
 0x22a   : > { %v664_v7 = vpop.f32.mrf.mxu3 }
 0x22b   : > { %v526_v2 = vpop.f32.mrf.mxu2 }
 0x22c   : > { %v550_v3 = vadd.f32 %v549_v1, %v526_v2 }
 0x230   : > { %v577_v5 = vpop.f32.mrf.mxu0 }
 0x231   : > { %v580_v6 = vadd.f32 %v577_v5, %v550_v3 }
 0x233   : > { %v609_v8 = vadd.f32 %v606_v4, %v580_v6 }
 0x236   : > { %v635_v9 = vpop.f32.mrf.mxu2  ;;  %v722_v10 = vpop.f32.mrf.mxu1 }
 0x237   : > { %v638_v11 = vadd.f32 %v635_v9, %v609_v8 }
 0x238   : > { %v693_v12 = vpop.f32.mrf.mxu0 }
 0x239   : > { %v667_v13 = vadd.f32 %v664_v7, %v638_v11 }
 0x23b   : > { %v696_v14 = vadd.f32 %v693_v12, %v667_v13 }
 0x23c   : > { %v779_v16 = vpop.f32.mrf.mxu3 }
 0x23d   : > { %v725_v15 = vadd.f32 %v722_v10, %v696_v14 }
 0x23e   : > { %v837_v17 = vpop.f32.mrf.mxu1  ;;  %v749_v18 = vpop.f32.mrf.mxu2 }
 0x23f   : > { %v752_v19 = vadd.f32 %v749_v18, %v725_v15 }
 0x240   : > { %v808_v20 = vpop.f32.mrf.mxu0 }
 0x241   : > { %v782_v21 = vadd.f32 %v779_v16, %v752_v19 }
 0x243   : > { %v811_v22 = vadd.f32 %v808_v20, %v782_v21 }
 0x244   : > { %v895_v23 = vpop.f32.mrf.mxu3 }
 0x245   : > { %v840_v24 = vadd.f32 %v837_v17, %v811_v22 }
 0x246   : > { %v953_v25 = vpop.f32.mrf.mxu1  ;;  %v866_v26 = vpop.f32.mrf.mxu2 }
 0x247   : > { %v869_v27 = vadd.f32 %v866_v26, %v840_v24 }
 0x248   : > { %v924_v28 = vpop.f32.mrf.mxu0 }
 0x249   : > { %v898_v29 = vadd.f32 %v895_v23, %v869_v27 }
 0x24b   : > { %v927_v30 = vadd.f32 %v924_v28, %v898_v29 }
 0x24c   : > { %v1010_v31 = vpop.f32.mrf.mxu3 }
 0x24d   : > { %v956_v32 = vadd.f32 %v953_v25, %v927_v30 }
 0x24e   : > { %v1068_v33 = vpop.f32.mrf.mxu1  ;;  %v980_v34 = vpop.f32.mrf.mxu2 }
 0x24f   : > { %v983_v35 = vadd.f32 %v980_v34, %v956_v32 }
 0x250   : > { %v1039_v36 = vpop.f32.mrf.mxu0 }
 0x251   : > { %v1013_v37 = vadd.f32 %v1010_v31, %v983_v35 }
 0x253   : > { %v1042_v38 = vadd.f32 %v1039_v36, %v1013_v37 }
 0x254   : > { %v1126_v39 = vpop.f32.mrf.mxu3 }
 0x255   : > { %v1071_v40 = vadd.f32 %v1068_v33, %v1042_v38 }
 0x256   : > { %v1097_v41 = vpop.f32.mrf.mxu2  ;;  %v1184_v42 = vpop.f32.mrf.mxu1 }
 0x257   : > { %v1100_v43 = vadd.f32 %v1097_v41, %v1071_v40 }
 0x258   : > { %v1155_v44 = vpop.f32.mrf.mxu0 }
 0x259   : > { %v1129_v45 = vadd.f32 %v1126_v39, %v1100_v43 }
 0x25b   : > { %v1158_v46 = vadd.f32 %v1155_v44, %v1129_v45 }
 0x25c   : > { %v1241_v47 = vpop.f32.mrf.mxu3 }
 0x25d   : > { %v1187_v48 = vadd.f32 %v1184_v42, %v1158_v46 }
 0x25e   : > { %v1211_v49 = vpop.f32.mrf.mxu2  ;;  %v1299_v52 = vpop.f32.mrf.mxu1 }
 0x25f   : > { %v1214_v50 = vadd.f32 %v1211_v49, %v1187_v48 }
 0x260   : > { %v1270_v51 = vpop.f32.mrf.mxu0 }
 0x261   : > { %v1244_v53 = vadd.f32 %v1241_v47, %v1214_v50 }
 0x263   : > { %v1273_v54 = vadd.f32 %v1270_v51, %v1244_v53 }
 0x264   : > { %v1357_v57 = vpop.f32.mrf.mxu3 }
 0x265   : > { %v1302_v55 = vadd.f32 %v1299_v52, %v1273_v54 }
 0x266   : > { %v1328_v56 = vpop.f32.mrf.mxu2  ;;  %v1415_v61 = vpop.f32.mrf.mxu1 }
 0x267   : > { %v1331_v58 = vadd.f32 %v1328_v56, %v1302_v55 }
 0x268   : > { %v1386_v59 = vpop.f32.mrf.mxu0 }
 0x269   : > { %v1360_v60 = vadd.f32 %v1357_v57, %v1331_v58 }
 0x26b   : > { %v1389_v62 = vadd.f32 %v1386_v59, %v1360_v60 }
 0x26d   : > { %v1418_v0 = vadd.f32 %v1415_v61, %v1389_v62 }
 0x26f   : > { %v1425_v1 = vadd.f32 %v1423_v63, %v1418_v0 }
 0x271   : > { %1427 = vst.msk [vmem:[%s271_s14] sm:$0xff] %vm1426_vm3, %v1425_v1 }
 0x272   : > { %1688 = shalt.err (!%p1685_p3)
}
 0x273   : > { %1601 = dma.vmem_to_hbm [thread:$0]  (%p1811_p5), %s1442_s15, 128, %s1444_s18, %s1429_s28  }
 0x274 PF: > { %p1607_p4 = scmp.ge.s32.totalorder %s1723_s27, 2  ;;  %s1455_s23 = sand.u32 1, %s1711_s24  }
 0x275   : > { %s1456_s8 = scalar_lea.sflag [#allocation4], %s1455_s23 }
 0x276   : > { %p1604_p7 = pnand %p1607_p4, %p1815_p6 }
 0x278   : > { %p1605_p8 = pneg %p1604_p7 }
 0x27a   : > { %1706 = dma.done.wait (%p1605_p8), %s1456_s8, 128  }
 0x27b   : > { %1708 = vsyncadd (%p1605_p8), %s1456_s8, 4294967168  ;;  %p17_p9 = scmp.ge.s32.totalorder %s1798_s30, 4   ;;  %s2170_s24 = smov %s1715_s25 }
 0x27c   : > { %s2171_s25 = smov %s1719_s26  ;;  %s2172_s26 = smov %s1809_s10 }
 0x27d   : > { %s2173_s27 = smov %s1798_s30  ;;  %19 = sbr.rel (!%p17_p9) target bundleno = 3 (0x3), region = 116 }
 0x282   :  { %1462 = vsyncpa [#allocation4], 1 }
 0x283   :  { %1464 = vsyncpa [#allocation4 + $0x1], 1 }

</bundles_post_ra>
